<compile_context>
chip_gen: v5e
topology: v5e:2x2
jax: 0.10.0
libtpu: 0.0.40
codegen_flags: <defaults>
</compile_context>

<pallas_src>
import functools

import jax
import jax.numpy as jnp
from jax.experimental import pallas as pl
from jax.experimental.pallas import tpu as pltpu


def _linear_kernel(xT_ref, w_ref, b_ref, o_ref):
    # xT_ref: (3, TB) f32 in VMEM  -- batch on the lane axis (lane-dense)
    # w_ref : (3,)    f32 in SMEM  -- per-input-feature weights
    # b_ref : (1,)    f32 in SMEM  -- bias
    # o_ref : (1, TB) f32 in VMEM  -- lane-dense output stores
    y = xT_ref[0:1, :] * w_ref[0]
    y = y + xT_ref[1:2, :] * w_ref[1]
    y = y + xT_ref[2:3, :] * w_ref[2]
    o_ref[...] = y + b_ref[0]


def _round_up(x, m):
    return ((x + m - 1) // m) * m


@functools.partial(jax.jit, static_argnames=("block_b", "xla_small_batch_cutoff"))
def simple_model_forward(x, weight, bias, *, block_b=131072, xla_small_batch_cutoff=0):
    """y = x @ weight.T + bias  (torch.nn.Linear(3, 1) forward).

    x:      (B, 3) float32
    weight: (1, 3) float32  (PyTorch layout: (out_features, in_features))
    bias:   (1,)   float32
    returns (B, 1) float32
    """
    B, K = x.shape
    OUT, K2 = weight.shape
    assert K == K2 == 3 and OUT == 1
    assert block_b % 128 == 0

    # Keep accumulation in f32 regardless of incoming dtype (review concern).
    x = x.astype(jnp.float32)
    w = weight.reshape(K).astype(jnp.float32)   # (3,) -> SMEM
    b = bias.reshape(1).astype(jnp.float32)     # (1,) -> SMEM

    if B <= xla_small_batch_cutoff:
        # Review: for tiny B the pallas launch/DMA-setup cost dominates; let XLA
        # fuse it.  Default cutoff is 0 so this demo always runs the kernel.
        return x @ w.reshape(K, 1) + b

    xT = x.T  # (3, B): batch on the lane axis (see TODO above)

    cost = pl.CostEstimate(flops=6 * B, transcendentals=0, bytes_accessed=16 * B)

    if B <= 1024:
        # Single whole-array block: no grid, no pipelining machinery.
        yT = pl.pallas_call(
            _linear_kernel,
            out_shape=jax.ShapeDtypeStruct((1, B), jnp.float32),
            in_specs=[
                pl.BlockSpec(memory_space=pltpu.MemorySpace.VMEM),
                pl.BlockSpec(memory_space=pltpu.MemorySpace.SMEM),
                pl.BlockSpec(memory_space=pltpu.MemorySpace.SMEM),
            ],
            out_specs=pl.BlockSpec(memory_space=pltpu.MemorySpace.VMEM),
            cost_estimate=cost,
        )(xT, w, b)
    else:
        # Tile only the batch (lane) axis.  No padding / no output slice: the
        # grid is cdiv(B, tile) and the tail block's writeback is masked.
        # >=2 grid steps so "parallel" shards the batch across TensorCores.
        tile = min(block_b, _round_up(pl.cdiv(B, 2), 128))
        grid = (pl.cdiv(B, tile),)
        yT = pl.pallas_call(
            _linear_kernel,
            out_shape=jax.ShapeDtypeStruct((1, B), jnp.float32),
            grid=grid,
            in_specs=[
                pl.BlockSpec((K, tile), lambda i: (0, i)),
                pl.BlockSpec(memory_space=pltpu.MemorySpace.SMEM),
                pl.BlockSpec(memory_space=pltpu.MemorySpace.SMEM),
            ],
            out_specs=pl.BlockSpec((1, tile), lambda i: (0, i)),
            compiler_params=pltpu.CompilerParams(
                dimension_semantics=("parallel",),
                vmem_limit_bytes=32 * 1024 * 1024,
            ),
            cost_estimate=cost,
        )(xT, w, b)

    # (1, B) -> (B, 1): pure metadata reshape (no data movement).
    return yT.reshape(B, 1)


if __name__ == "__main__":
    key = jax.random.PRNGKey(0)
    kx, kw, kb, kx2 = jax.random.split(key, 4)

    IN, OUT = 3, 1

    # nn.Linear-style init: U(-1/sqrt(in), 1/sqrt(in)); weight stored as (out, in).
    bound = 1.0 / jnp.sqrt(jnp.float32(IN))
    weight = jax.random.uniform(kw, (OUT, IN), jnp.float32, -bound, bound)
    bias = jax.random.uniform(kb, (OUT,), jnp.float32, -bound, bound)

    # Small batch -> gridless single-block path.
    B_small = 8
    x_small = jax.random.normal(kx, (B_small, IN), jnp.float32)
    y_small = simple_model_forward(x_small, weight, bias)
    jax.block_until_ready(y_small)
    ref_small = x_small @ weight.T + bias
    assert y_small.shape == (B_small, OUT)
    assert jnp.allclose(y_small, ref_small, atol=1e-5, rtol=1e-5)

    # Larger batch, not a multiple of the tile -> gridded path with 2 parallel
    # steps and a masked tail block (no pad, no slice).
    B_large = 2500
    x_large = jax.random.normal(kx2, (B_large, IN), jnp.float32)
    y_large = simple_model_forward(x_large, weight, bias)
    jax.block_until_ready(y_large)
    ref_large = x_large @ weight.T + bias
    assert y_large.shape == (B_large, OUT)
    assert jnp.allclose(y_large, ref_large, atol=1e-5, rtol=1e-5)

    print("KERNEL_OK")
</pallas_src>

<mosaic_0001>
module attributes {stable_mosaic.version = 11 : i64} {
  func.func @_linear_kernel(%arg0: memref<3x8xf32, #tpu.memory_space<vmem>>, %arg1: memref<3xf32, #tpu.memory_space<smem>>, %arg2: memref<1xf32, #tpu.memory_space<smem>>, %arg3: memref<1x8xf32, #tpu.memory_space<vmem>>) attributes {dimension_semantics = [], scalar_prefetch = 0 : i64, scratch_operands = 0 : i64, tpu.core_type = #tpu.core_type<tc>} {
    %c0 = arith.constant 0 : index
    %c0_0 = arith.constant 0 : index
    %0 = vector.load %arg0[%c0, %c0_0] : memref<3x8xf32, #tpu.memory_space<vmem>>, vector<1x8xf32>
    %c0_1 = arith.constant 0 : index
    %1 = memref.load %arg1[%c0_1] : memref<3xf32, #tpu.memory_space<smem>>
    %2 = vector.broadcast %1 : f32 to vector<1x8xf32>
    %3 = arith.mulf %0, %2 : vector<1x8xf32>
    %c1 = arith.constant 1 : index
    %c0_2 = arith.constant 0 : index
    %4 = vector.load %arg0[%c1, %c0_2] : memref<3x8xf32, #tpu.memory_space<vmem>>, vector<1x8xf32>
    %c1_3 = arith.constant 1 : index
    %5 = memref.load %arg1[%c1_3] : memref<3xf32, #tpu.memory_space<smem>>
    %6 = vector.broadcast %5 : f32 to vector<1x8xf32>
    %7 = arith.mulf %4, %6 : vector<1x8xf32>
    %8 = arith.addf %3, %7 : vector<1x8xf32>
    %c2 = arith.constant 2 : index
    %c0_4 = arith.constant 0 : index
    %9 = vector.load %arg0[%c2, %c0_4] : memref<3x8xf32, #tpu.memory_space<vmem>>, vector<1x8xf32>
    %c2_5 = arith.constant 2 : index
    %10 = memref.load %arg1[%c2_5] : memref<3xf32, #tpu.memory_space<smem>>
    %11 = vector.broadcast %10 : f32 to vector<1x8xf32>
    %12 = arith.mulf %9, %11 : vector<1x8xf32>
    %13 = arith.addf %8, %12 : vector<1x8xf32>
    %c0_6 = arith.constant 0 : index
    %14 = memref.load %arg2[%c0_6] : memref<1xf32, #tpu.memory_space<smem>>
    %15 = vector.broadcast %14 : f32 to vector<1x8xf32>
    %16 = arith.addf %13, %15 : vector<1x8xf32>
    %c0_7 = arith.constant 0 : index
    %c0_8 = arith.constant 0 : index
    %17 = vector.load %arg3[%c0_7, %c0_8] : memref<1x8xf32, #tpu.memory_space<vmem>>, vector<1x8xf32>
    tpu.vector_store %arg3[%c0_7, %c0_8], %16 {strides = array<i32>} : memref<1x8xf32, #tpu.memory_space<vmem>>, vector<1x8xf32>,
    return
  }
}

</mosaic_0001>

<bundles_post_ra>
// kernel: simple_model_forward.1
= control target key start
LH: loop header
LB: loop body
LE: loop exit
PB: predicated region body
PF: predicated region fallthrough
CT: control target
= control target key end

     0   :  { %9 = vsyncpa [#allocation4], 0  ;;  %s186_s0 = inlined_call_operand.hbm [shape: f32[3,8], index: 0, kind: input, shape index: {}]   ;;  %s187_s1 = inlined_call_operand.vmem [shape: f32[3], index: 1, kind: input, shape index: {}]   ;;  %s188_s2 = inlined_call_operand.<no memory space> [shape: f32[1], index: 2, kind: input, shape index: {}]   ;;  %s189_s3 = inlined_call_operand.hbm [shape: f32[1,8], index: 3, kind: output, shape index: {}]  }
   0x1   :  { %10 = vsyncpa [#allocation6], 0 }
   0x2   :  { %11 = vsyncpa [#allocation5], 0  ;;  %s17_s14 = sshll.u32 %s186_s0, 4  ;;  %s151_s15 = smov [#allocation3]   ;;  %s18_s14 = int_to_ptr.hbm [resolvable:$true] %s17_s14 }
   0x3   :  { %s19_s16 = sshll.u32 %s151_s15, 4  ;;  %s28_s19 = sshll.u32 %s187_s1, 4  ;;  %s20_s16 = int_to_ptr.vmem [resolvable:$true] %s19_s16  ;;  %s29_s19 = int_to_ptr.vmem [resolvable:$true] %s28_s19 }
   0x4   :  { %22 = dma.hbm_to_vmem [thread:$0]  %s18_s14, 64, %s20_s16, [#allocation4]  }
   0x5   :  { %s152_s20 = smov [#allocation7]  }
   0x6   :  { %31 = dma.vmem_to_smem %s29_s19, 16, %s152_s20, [#allocation6]  }
   0x7   :  { %145 = dma.done.wait [#allocation4], 64  }
   0x8   :  { %146 = vsyncadd [#allocation4], 4294967232 }
   0x9   :  { %147 = dma.done.wait [#allocation6], 16  }
   0xa   :  { %148 = vsyncadd [#allocation6], 4294967280 }
   0xb   :  { %42 = sfence }
   0xc   :  { %s44_s21 = sld [smem:[#allocation7]]  ;;  %v43_v0 = vld [vmem:[#allocation3] sm:$0x1]  ;;  %v47_v1 = vld [vmem:[#allocation3 + $0x1] sm:$0x1]  ;;  %v58_v10 = vstv %s188_s2  ;;  %s153_s24 = smov [#allocation8]  }
   0xd   :  { %s80_s22 = sld [smem:[#allocation7 + $0x1]]  ;;  %v52_v3 = vld [vmem:[#allocation3 + $0x2] sm:$0x1]  ;;  %s67_s25 = sshll.u32 %s153_s24, 4  ;;  %vm60_vm0 = vcmask 57344   ;;  %s68_s25 = int_to_ptr.vmem [resolvable:$true] %s67_s25 }
   0xe   :  { %s81_s0 = sld [smem:[#allocation7 + $0x2]]  ;;  %s69_s28 = sshll.u32 %s189_s3, 4  ;;  %s70_s28 = int_to_ptr.hbm [resolvable:$true] %s69_s28 }
  0x12   :  { %v45_v2 = vstv %s44_s21 }
  0x13   :  { %v46_v4 = vmul.f32 %v45_v2, %v43_v0  ;;  %v49_v5 = vstv %s80_s22 }
  0x14   :  { %v50_v6 = vmul.f32 %v49_v5, %v47_v1  ;;  %v54_v7 = vstv %s81_s0 }
  0x15   :  { %v55_v8 = vmul.f32 %v54_v7, %v52_v3 }
  0x16   :  { %v51_v9 = vadd.f32 %v50_v6, %v46_v4 }
  0x18   :  { %v56_v11 = vadd.f32 %v55_v8, %v51_v9 }
  0x1a   :  { %v59_v12 = vadd.f32 %v58_v10, %v56_v11 }
  0x1c   :  { %61 = vst.msk [vmem:[#allocation8] sm:$0x1] %vm60_vm0, %v59_v12 }
  0x1d   :  { %72 = dma.vmem_to_hbm [thread:$0]  %s68_s25, 16, %s70_s28, [#allocation5]  }
  0x1e   :  { %149 = dma.done.wait [#allocation5], 16  }
  0x1f   :  { %150 = vsyncadd [#allocation5], 4294967280 }
  0x20   :  { %77 = vsyncpa [#allocation4], 1 }
  0x21   :  { %78 = vsyncpa [#allocation5], 1 }
  0x22   :  { %79 = vsyncpa [#allocation6], 1 }

</bundles_post_ra>
